<compile_context>
chip_gen: v7x
topology: tpu7x:2x2x1
jax: 0.10.0
libtpu: 0.0.40
codegen_flags: <defaults>
</compile_context>

<pallas_src>
import functools

import jax
import jax.numpy as jnp
from jax.experimental import pallas as pl
from jax.experimental.pallas import tpu as pltpu


def _char_rnn_kernel(x_ref, h0_ref, w_ref, b_ref, wlin_ref, blin_ref,
                     out_ref, hidden_out_ref):
    """Whole problem VMEM-resident; one fused MXU matmul per GRU layer + head matmul.

    Fused per-layer weight layout (KMAX + H rows, 4H cols), PyTorch gate order [r,z,n]:
        cols [0:2H]  : W_ih^T[:, :2H] stacked over W_hh^T[:, :2H]   -> i_r+h_r, i_z+h_z
        cols [2H:3H] : W_ih^T[:, 2H:] on input rows, zeros on hidden rows -> i_n
        cols [3H:4H] : zeros on input rows, W_hh^T[:, 2H:] on hidden rows -> h_n
    Fused bias: [b_ih[:2H] + b_hh[:2H], b_ih[2H:], b_hh[2H:]].
    """
    L, B, H = h0_ref.shape
    KMAX = x_ref.shape[1]

    inp = x_ref[...].astype(jnp.float32)                 # (B, KMAX), layer-0 input
    h_last = None
    for layer in range(L):                               # small static L: unrolled
        h_prev = h0_ref[layer].astype(jnp.float32)       # (B, H)
        xh = jnp.concatenate([inp, h_prev], axis=1)      # (B, KMAX + H)
        g = jnp.dot(xh, w_ref[layer],
                    preferred_element_type=jnp.float32) + b_ref[layer]  # (B, 4H)

        rz = jax.nn.sigmoid(g[:, :2 * H])
        r, z = rz[:, :H], rz[:, H:]
        n = jnp.tanh(g[:, 2 * H:3 * H] + r * g[:, 3 * H:])
        h_new = (1.0 - z) * n + z * h_prev               # (B, H)

        hidden_out_ref[layer] = h_new.astype(hidden_out_ref.dtype)
        h_last = h_new
        if layer + 1 < L:
            if KMAX > H:   # only if io_size > hidden_size: re-pad next layer's input
                inp = jnp.concatenate(
                    [h_new, jnp.zeros((B, KMAX - H), jnp.float32)], axis=1)
            else:
                inp = h_new
        # TODO(synk): GRU inter-layer dropout only applies in training mode; omitted (eval).

    # Final linear + log_softmax over the io dimension.
    logits = jnp.dot(h_last, wlin_ref[...],
                     preferred_element_type=jnp.float32) + blin_ref[...]
    m = jnp.max(logits, axis=-1, keepdims=True)
    shifted = logits - m
    lse = jnp.log(jnp.sum(jnp.exp(shifted), axis=-1, keepdims=True))
    out_ref[...] = (shifted - lse).astype(out_ref.dtype)


def init_params(key, io_size, hidden_size, num_layers):
    """Deterministic parameter init matching PyTorch shapes (gate order r,z,n)."""
    k = 1.0 / jnp.sqrt(hidden_size)
    params = {}
    keys = jax.random.split(key, 4 * num_layers + 2)
    ki = 0
    for layer in range(num_layers):
        in_dim = io_size if layer == 0 else hidden_size
        params[f"w_ih_l{layer}"] = jax.random.uniform(
            keys[ki], (3 * hidden_size, in_dim), jnp.float32, -k, k); ki += 1
        params[f"w_hh_l{layer}"] = jax.random.uniform(
            keys[ki], (3 * hidden_size, hidden_size), jnp.float32, -k, k); ki += 1
        params[f"b_ih_l{layer}"] = jax.random.uniform(
            keys[ki], (3 * hidden_size,), jnp.float32, -k, k); ki += 1
        params[f"b_hh_l{layer}"] = jax.random.uniform(
            keys[ki], (3 * hidden_size,), jnp.float32, -k, k); ki += 1
    params["lin_w"] = jax.random.uniform(
        keys[ki], (io_size, hidden_size), jnp.float32, -k, k); ki += 1
    params["lin_b"] = jax.random.uniform(
        keys[ki], (io_size,), jnp.float32, -k, k)
    return params


def pack_params(params, io_size, hidden_size, num_layers):
    """ONE-TIME repacking of PyTorch-layout GRU/Linear params into fused kernel slabs.

    Keep the result cached by the caller; the jitted hot path does no repacking.
    TODO(synk): for production sizes (H >= 1024, L >= 4) stream layers with a grid
    over L instead of a fully VMEM-resident slab (v7x has only 64 MiB VMEM).
    """
    I, H, L = io_size, hidden_size, num_layers
    KMAX = max(I, H)
    w_layers, b_layers = [], []
    for layer in range(L):
        in_dim = I if layer == 0 else H
        wih = params[f"w_ih_l{layer}"].T.astype(jnp.float32)   # (in_dim, 3H)
        whh = params[f"w_hh_l{layer}"].T.astype(jnp.float32)   # (H, 3H)
        bih = params[f"b_ih_l{layer}"].astype(jnp.float32)     # (3H,)
        bhh = params[f"b_hh_l{layer}"].astype(jnp.float32)     # (3H,)

        w = jnp.zeros((KMAX + H, 4 * H), jnp.float32)
        w = w.at[:in_dim, 0:2 * H].set(wih[:, 0:2 * H])          # r,z (input rows)
        w = w.at[KMAX:, 0:2 * H].set(whh[:, 0:2 * H])            # r,z (hidden rows)
        w = w.at[:in_dim, 2 * H:3 * H].set(wih[:, 2 * H:3 * H])  # i_n
        w = w.at[KMAX:, 3 * H:4 * H].set(whh[:, 2 * H:3 * H])    # h_n
        b = jnp.concatenate(
            [bih[:2 * H] + bhh[:2 * H], bih[2 * H:], bhh[2 * H:]]).reshape(1, 4 * H)
        w_layers.append(w)
        b_layers.append(b)

    return {
        "w": jnp.stack(w_layers),                              # (L, KMAX + H, 4H)
        "b": jnp.stack(b_layers),                              # (L, 1, 4H)
        "wlin": params["lin_w"].T.astype(jnp.float32),         # (H, I)
        "blin": params["lin_b"].reshape(1, I).astype(jnp.float32),
    }


@functools.partial(jax.jit, static_argnames=("io_size", "hidden_size", "num_layers"))
def char_rnn_no_top(x, hidden, packed, *, io_size, hidden_size, num_layers):
    """Hot path: only a trivial x pad + the pallas_call. `packed` is from pack_params."""
    B = x.shape[0]
    I, H, L = io_size, hidden_size, num_layers
    KMAX = max(I, H)

    if hidden is None:
        hidden = jnp.zeros((L, B, H), jnp.float32)

    x_in = x.astype(jnp.float32)
    if I < KMAX:  # zero-pad x lanes so every layer's fused matmul shares the same K
        x_in = jnp.concatenate([x_in, jnp.zeros((B, KMAX - I), jnp.float32)], axis=1)

    vmem = pl.BlockSpec(memory_space=pltpu.MemorySpace.VMEM)
    out_shapes = (jax.ShapeDtypeStruct((B, I), jnp.float32),
                  jax.ShapeDtypeStruct((L, B, H), jnp.float32))

    log_probs, new_hidden = pl.pallas_call(
        _char_rnn_kernel,
        out_shape=out_shapes,
        in_specs=[vmem] * 6,
        out_specs=(vmem, vmem),
        input_output_aliases={1: 1},   # hidden updated in place (P8)
    )(x_in, hidden, packed["w"], packed["b"], packed["wlin"], packed["blin"])
    # TODO(synk): for large batch on v7x, add a 1-D grid over batch tiles with
    # dimension_semantics=("parallel",) to use both TensorCores; pointless at B=8.
    return log_probs, new_hidden


def _reference(x, hidden, params, io_size, hidden_size, num_layers):
    """Pure-JAX reference of the PyTorch forward (eval mode)."""
    B, H, L = x.shape[0], hidden_size, num_layers
    if hidden is None:
        hidden = jnp.zeros((L, B, H), jnp.float32)
    inp = x
    new_h = []
    for layer in range(L):
        h_prev = hidden[layer]
        gi = inp @ params[f"w_ih_l{layer}"].T + params[f"b_ih_l{layer}"]
        gh = h_prev @ params[f"w_hh_l{layer}"].T + params[f"b_hh_l{layer}"]
        i_r, i_z, i_n = jnp.split(gi, 3, axis=1)
        h_r, h_z, h_n = jnp.split(gh, 3, axis=1)
        r = jax.nn.sigmoid(i_r + h_r)
        z = jax.nn.sigmoid(i_z + h_z)
        n = jnp.tanh(i_n + r * h_n)
        h_new = (1.0 - z) * n + z * h_prev
        new_h.append(h_new)
        inp = h_new
    logits = inp @ params["lin_w"].T + params["lin_b"]
    return jax.nn.log_softmax(logits, axis=-1), jnp.stack(new_h)


if __name__ == "__main__":
    io_size, hidden_size, num_layers = 16, 32, 2
    batch = 8

    key = jax.random.PRNGKey(0)
    k_param, k_x = jax.random.split(key)
    params = init_params(k_param, io_size, hidden_size, num_layers)
    packed = pack_params(params, io_size, hidden_size, num_layers)  # one-time prep

    # x is a (batch, io_size) input (e.g. one-hot-ish char embedding per step).
    x = jax.random.normal(k_x, (batch, io_size), jnp.float32)

    log_probs, new_hidden = char_rnn_no_top(
        x, None, packed,
        io_size=io_size, hidden_size=hidden_size, num_layers=num_layers)
    jax.block_until_ready((log_probs, new_hidden))

    ref_lp, ref_h = _reference(x, None, params, io_size, hidden_size, num_layers)
    assert log_probs.shape == (batch, io_size)
    assert new_hidden.shape == (num_layers, batch, hidden_size)
    assert jnp.allclose(log_probs, ref_lp, atol=1e-5, rtol=1e-5)
    assert jnp.allclose(new_hidden, ref_h, atol=1e-5, rtol=1e-5)

    print("KERNEL_OK")
</pallas_src>

<mosaic_0001>
module attributes {stable_mosaic.version = 11 : i64} {
  func.func @_char_rnn_kernel(%arg0: memref<8x32xf32, #tpu.memory_space<vmem>>, %arg1: memref<2x8x32xf32, #tpu.memory_space<vmem>>, %arg2: memref<2x64x128xf32, #tpu.memory_space<vmem>>, %arg3: memref<2x1x128xf32, #tpu.memory_space<vmem>>, %arg4: memref<32x16xf32, #tpu.memory_space<vmem>>, %arg5: memref<1x16xf32, #tpu.memory_space<vmem>>, %arg6: memref<8x16xf32, #tpu.memory_space<vmem>>, %arg7: memref<2x8x32xf32, #tpu.memory_space<vmem>>) attributes {dimension_semantics = [], scalar_prefetch = 0 : i64, scratch_operands = 0 : i64, tpu.core_type = #tpu.core_type<tc>} {
    %c0 = arith.constant 0 : index
    %c0_0 = arith.constant 0 : index
    %0 = vector.load %arg0[%c0, %c0_0] : memref<8x32xf32, #tpu.memory_space<vmem>>, vector<8x32xf32>
    %c0_1 = arith.constant 0 : index
    %c0_2 = arith.constant 0 : index
    %c0_3 = arith.constant 0 : index
    %1 = vector.load %arg1[%c0_1, %c0_2, %c0_3] : memref<2x8x32xf32, #tpu.memory_space<vmem>>, vector<1x8x32xf32>
    %2 = vector.shape_cast %1 : vector<1x8x32xf32> to vector<8x32xf32>
    %3 = tpu.concatenate %0, %2 in 1 : vector<8x32xf32>, vector<8x32xf32> -> vector<8x64xf32>
    %c0_4 = arith.constant 0 : index
    %c0_5 = arith.constant 0 : index
    %c0_6 = arith.constant 0 : index
    %4 = vector.load %arg2[%c0_4, %c0_5, %c0_6] : memref<2x64x128xf32, #tpu.memory_space<vmem>>, vector<1x64x128xf32>
    %5 = vector.shape_cast %4 : vector<1x64x128xf32> to vector<64x128xf32>
    %cst = arith.constant dense<0.000000e+00> : vector<8x128xf32>
    %6 = tpu.matmul %3, %5, %cst {dimension_numbers = #tpu.dot_dimension_numbers<[1], [0], [0], [1], [0, 0, 1, 1], [], []>} : vector<8x64xf32>, vector<64x128xf32>, vector<8x128xf32> -> vector<8x128xf32>
    %c0_7 = arith.constant 0 : index
    %c0_8 = arith.constant 0 : index
    %c0_9 = arith.constant 0 : index
    %7 = vector.load %arg3[%c0_7, %c0_8, %c0_9] : memref<2x1x128xf32, #tpu.memory_space<vmem>>, vector<1x1x128xf32>
    %8 = vector.shape_cast %7 : vector<1x1x128xf32> to vector<1x128xf32>
    %9 = vector.broadcast %8 : vector<1x128xf32> to vector<8x128xf32>
    %10 = arith.addf %6, %9 : vector<8x128xf32>
    %11 = vector.extract_strided_slice %10 {offsets = [0, 0], sizes = [8, 64], strides = [1, 1]} : vector<8x128xf32> to vector<8x64xf32>
    %12 = arith.negf %11 : vector<8x64xf32>
    %13 = math.exp %12 : vector<8x64xf32>
    %cst_10 = arith.constant 1.000000e+00 : f32
    %14 = vector.broadcast %cst_10 : f32 to vector<8x64xf32>
    %15 = arith.addf %14, %13 : vector<8x64xf32>
    %16 = arith.divf %14, %15 : vector<8x64xf32>
    %17 = vector.extract_strided_slice %16 {offsets = [0, 0], sizes = [8, 32], strides = [1, 1]} : vector<8x64xf32> to vector<8x32xf32>
    %18 = vector.extract_strided_slice %16 {offsets = [0, 32], sizes = [8, 32], strides = [1, 1]} : vector<8x64xf32> to vector<8x32xf32>
    %19 = vector.extract_strided_slice %10 {offsets = [0, 64], sizes = [8, 32], strides = [1, 1]} : vector<8x128xf32> to vector<8x32xf32>
    %20 = vector.extract_strided_slice %10 {offsets = [0, 96], sizes = [8, 32], strides = [1, 1]} : vector<8x128xf32> to vector<8x32xf32>
    %21 = arith.mulf %17, %20 : vector<8x32xf32>
    %22 = arith.addf %19, %21 : vector<8x32xf32>
    %23 = math.tanh %22 : vector<8x32xf32>
    %cst_11 = arith.constant 1.000000e+00 : f32
    %24 = vector.broadcast %cst_11 : f32 to vector<8x32xf32>
    %25 = arith.subf %24, %18 : vector<8x32xf32>
    %26 = arith.mulf %25, %23 : vector<8x32xf32>
    %27 = arith.mulf %18, %2 : vector<8x32xf32>
    %28 = arith.addf %26, %27 : vector<8x32xf32>
    %c0_12 = arith.constant 0 : index
    %c0_13 = arith.constant 0 : index
    %c0_14 = arith.constant 0 : index
    %29 = vector.load %arg7[%c0_12, %c0_13, %c0_14] : memref<2x8x32xf32, #tpu.memory_space<vmem>>, vector<1x8x32xf32>
    %30 = vector.shape_cast %29 : vector<1x8x32xf32> to vector<8x32xf32>
    %31 = vector.shape_cast %28 : vector<8x32xf32> to vector<1x8x32xf32>
    tpu.vector_store %arg7[%c0_12, %c0_13, %c0_14], %31 {strides = array<i32>} : memref<2x8x32xf32, #tpu.memory_space<vmem>>, vector<1x8x32xf32>,
    %c1 = arith.constant 1 : index
    %c0_15 = arith.constant 0 : index
    %c0_16 = arith.constant 0 : index
    %32 = vector.load %arg1[%c1, %c0_15, %c0_16] : memref<2x8x32xf32, #tpu.memory_space<vmem>>, vector<1x8x32xf32>
    %33 = vector.shape_cast %32 : vector<1x8x32xf32> to vector<8x32xf32>
    %34 = tpu.concatenate %28, %33 in 1 : vector<8x32xf32>, vector<8x32xf32> -> vector<8x64xf32>
    %c1_17 = arith.constant 1 : index
    %c0_18 = arith.constant 0 : index
    %c0_19 = arith.constant 0 : index
    %35 = vector.load %arg2[%c1_17, %c0_18, %c0_19] : memref<2x64x128xf32, #tpu.memory_space<vmem>>, vector<1x64x128xf32>
    %36 = vector.shape_cast %35 : vector<1x64x128xf32> to vector<64x128xf32>
    %cst_20 = arith.constant dense<0.000000e+00> : vector<8x128xf32>
    %37 = tpu.matmul %34, %36, %cst_20 {dimension_numbers = #tpu.dot_dimension_numbers<[1], [0], [0], [1], [0, 0, 1, 1], [], []>} : vector<8x64xf32>, vector<64x128xf32>, vector<8x128xf32> -> vector<8x128xf32>
    %c1_21 = arith.constant 1 : index
    %c0_22 = arith.constant 0 : index
    %c0_23 = arith.constant 0 : index
    %38 = vector.load %arg3[%c1_21, %c0_22, %c0_23] : memref<2x1x128xf32, #tpu.memory_space<vmem>>, vector<1x1x128xf32>
    %39 = vector.shape_cast %38 : vector<1x1x128xf32> to vector<1x128xf32>
    %40 = vector.broadcast %39 : vector<1x128xf32> to vector<8x128xf32>
    %41 = arith.addf %37, %40 : vector<8x128xf32>
    %42 = vector.extract_strided_slice %41 {offsets = [0, 0], sizes = [8, 64], strides = [1, 1]} : vector<8x128xf32> to vector<8x64xf32>
    %43 = arith.negf %42 : vector<8x64xf32>
    %44 = math.exp %43 : vector<8x64xf32>
    %cst_24 = arith.constant 1.000000e+00 : f32
    %45 = vector.broadcast %cst_24 : f32 to vector<8x64xf32>
    %46 = arith.addf %45, %44 : vector<8x64xf32>
    %47 = arith.divf %45, %46 : vector<8x64xf32>
    %48 = vector.extract_strided_slice %47 {offsets = [0, 0], sizes = [8, 32], strides = [1, 1]} : vector<8x64xf32> to vector<8x32xf32>
    %49 = vector.extract_strided_slice %47 {offsets = [0, 32], sizes = [8, 32], strides = [1, 1]} : vector<8x64xf32> to vector<8x32xf32>
    %50 = vector.extract_strided_slice %41 {offsets = [0, 64], sizes = [8, 32], strides = [1, 1]} : vector<8x128xf32> to vector<8x32xf32>
    %51 = vector.extract_strided_slice %41 {offsets = [0, 96], sizes = [8, 32], strides = [1, 1]} : vector<8x128xf32> to vector<8x32xf32>
    %52 = arith.mulf %48, %51 : vector<8x32xf32>
    %53 = arith.addf %50, %52 : vector<8x32xf32>
    %54 = math.tanh %53 : vector<8x32xf32>
    %cst_25 = arith.constant 1.000000e+00 : f32
    %55 = vector.broadcast %cst_25 : f32 to vector<8x32xf32>
    %56 = arith.subf %55, %49 : vector<8x32xf32>
    %57 = arith.mulf %56, %54 : vector<8x32xf32>
    %58 = arith.mulf %49, %33 : vector<8x32xf32>
    %59 = arith.addf %57, %58 : vector<8x32xf32>
    %c1_26 = arith.constant 1 : index
    %c0_27 = arith.constant 0 : index
    %c0_28 = arith.constant 0 : index
    %60 = vector.load %arg7[%c1_26, %c0_27, %c0_28] : memref<2x8x32xf32, #tpu.memory_space<vmem>>, vector<1x8x32xf32>
    %61 = vector.shape_cast %60 : vector<1x8x32xf32> to vector<8x32xf32>
    %62 = vector.shape_cast %59 : vector<8x32xf32> to vector<1x8x32xf32>
    tpu.vector_store %arg7[%c1_26, %c0_27, %c0_28], %62 {strides = array<i32>} : memref<2x8x32xf32, #tpu.memory_space<vmem>>, vector<1x8x32xf32>,
    %c0_29 = arith.constant 0 : index
    %c0_30 = arith.constant 0 : index
    %63 = vector.load %arg4[%c0_29, %c0_30] : memref<32x16xf32, #tpu.memory_space<vmem>>, vector<32x16xf32>
    %cst_31 = arith.constant dense<0.000000e+00> : vector<8x16xf32>
    %64 = tpu.matmul %59, %63, %cst_31 {dimension_numbers = #tpu.dot_dimension_numbers<[1], [0], [0], [1], [0, 0, 1, 1], [], []>} : vector<8x32xf32>, vector<32x16xf32>, vector<8x16xf32> -> vector<8x16xf32>
    %c0_32 = arith.constant 0 : index
    %c0_33 = arith.constant 0 : index
    %65 = vector.load %arg5[%c0_32, %c0_33] : memref<1x16xf32, #tpu.memory_space<vmem>>, vector<1x16xf32>
    %66 = vector.broadcast %65 : vector<1x16xf32> to vector<8x16xf32>
    %67 = arith.addf %64, %66 : vector<8x16xf32>
    %cst_34 = arith.constant dense<0xFF800000> : vector<8xf32>
    %68 = vector.multi_reduction <maximumf>, %67, %cst_34 [1] : vector<8x16xf32> to vector<8xf32>
    %69 = vector.shape_cast %68 : vector<8xf32> to vector<8x1xf32>
    %70 = vector.broadcast %69 : vector<8x1xf32> to vector<8x16xf32>
    %71 = arith.subf %67, %70 : vector<8x16xf32>
    %72 = math.exp %71 : vector<8x16xf32>
    %cst_35 = arith.constant dense<0.000000e+00> : vector<8xf32>
    %73 = vector.multi_reduction <add>, %72, %cst_35 [1] : vector<8x16xf32> to vector<8xf32>
    %74 = vector.shape_cast %73 : vector<8xf32> to vector<8x1xf32>
    %75 = math.log %74 : vector<8x1xf32>
    %76 = vector.broadcast %75 : vector<8x1xf32> to vector<8x16xf32>
    %77 = arith.subf %71, %76 : vector<8x16xf32>
    %c0_36 = arith.constant 0 : index
    %c0_37 = arith.constant 0 : index
    %78 = vector.load %arg6[%c0_36, %c0_37] : memref<8x16xf32, #tpu.memory_space<vmem>>, vector<8x16xf32>
    tpu.vector_store %arg6[%c0_36, %c0_37], %77 {strides = array<i32>} : memref<8x16xf32, #tpu.memory_space<vmem>>, vector<8x16xf32>,
    return
  }
}

</mosaic_0001>

<bundles_post_ra>
// kernel: char_rnn_no_top.1
= control target key start
LH: loop header
LB: loop body
LE: loop exit
PB: predicated region body
PF: predicated region fallthrough
CT: control target
= control target key end

     0   :  { %13 = vsyncpa [#allocation3], 0  ;;  %s840_s0 = inlined_call_operand.vmem [shape: f32[8,32], index: 0, kind: input, shape index: {}]   ;;  %s841_s1 = inlined_call_operand.hbm [shape: f32[2,8,32], index: 1, kind: input, shape index: {}, may-alias: {1,7}]   ;;  %s842_s2 = inlined_call_operand.hbm [shape: f32[2,64,128], index: 2, kind: input, shape index: {}]   ;;  %s843_s3 = inlined_call_operand.vmem [shape: f32[2,1,128], index: 3, kind: input, shape index: {}]   ;;  %s844_s4 = inlined_call_operand.vmem [shape: f32[32,16], index: 4, kind: input, shape index: {}]   ;;  %s845_s5 = inlined_call_operand.vmem [shape: f32[1,16], index: 5, kind: input, shape index: {}]   ;;  %s846_s6 = inlined_call_operand.hbm [shape: f32[8,16], index: 6, kind: output, shape index: {0}]   ;;  %s847_s7 = inlined_call_operand.hbm [shape: f32[2,8,32], index: 7, kind: output, shape index: {1}, may-alias: {1,7}]  }
   0x1   :  { %14 = vsyncpa [#allocation6], 0 }
   0x2   :  { %15 = vsyncpa [#allocation4], 0 }
   0x3   :  { %16 = vsyncpa [#allocation9], 0  ;;  %s674_s24 = smov [#allocation2]   ;;  %s578_s28 = scalar_lea.hbm %s841_s1, 256 }
   0x4   :  { %s24_s25 = sshll.u32 %s674_s24, 4  ;;  %p579_p0 = scmp.ne.s32.totalorder %s841_s1, %s578_s28  ;;  %s25_s25 = int_to_ptr.vmem [resolvable:$true] %s24_s25 }
   0x5   :  { %p582_p1 = scmp.lt.u32.totalorder %s578_s28, %s841_s1 }
   0x7   :  { %p584_p2 = pnand %p582_p1, %p579_p0 }
   0x9   :  { %587 = shalt.err (!%p584_p2)
}
   0xa   :  { %s588_s10 = scalar_lea.vmem %s25_s25, 256  ;;  %p593_p4 = scmp.lt.s32.totalorder %s25_s25, %s25_s25 }
   0xb   :  { %p589_p3 = scmp.ne.s32.totalorder %s25_s25, %s588_s10  ;;  %p594_p5 = scmp.lt.s32.totalorder %s588_s10, %s588_s10 }
   0xd   :  { %p595_p6 = por %p594_p5, %p593_p4 }
   0xf   :  { %p596_p7 = pnand %p595_p6, %p589_p3 }
  0x11   :  { %599 = shalt.err (!%p596_p7)
}
  0x12   :  { %s675_s11 = smov 128   ;;  %s676_s12 = smov 8  }
  0x13   :  { %30 = dma.hbm_to_vmem [thread:$0]  %s841_s1, 256, %s25_s25, [#allocation3], %s675_s11, %s675_s11, %s676_s12  }
  0x14   :  { %s677_s15 = smov [#allocation5]   ;;  %s600_s19 = scalar_lea.hbm %s842_s2, 2048 }
  0x15   :  { %s36_s16 = sshll.u32 %s677_s15, 4  ;;  %p601_p8 = scmp.ne.s32.totalorder %s842_s2, %s600_s19  ;;  %s37_s16 = int_to_ptr.vmem [resolvable:$true] %s36_s16 }
  0x16   :  { %p604_p9 = scmp.lt.u32.totalorder %s600_s19, %s842_s2 }
  0x18   :  { %p606_p10 = pnand %p604_p9, %p601_p8 }
  0x1a   :  { %609 = shalt.err (!%p606_p10)
}
  0x1b   :  { %s610_s24 = scalar_lea.vmem %s37_s16, 2048  ;;  %p615_p12 = scmp.lt.s32.totalorder %s37_s16, %s37_s16 }
  0x1c   :  { %p611_p11 = scmp.ne.s32.totalorder %s37_s16, %s610_s24  ;;  %p616_p13 = scmp.lt.s32.totalorder %s610_s24, %s610_s24 }
  0x1e   :  { %p617_p0 = por %p616_p13, %p615_p12 }
  0x20   :  { %p618_p1 = pnand %p617_p0, %p611_p11 }
  0x22   :  { %621 = shalt.err (!%p618_p1)
}
  0x23   :  { %42 = dma.hbm_to_vmem [thread:$0]  %s842_s2, 2048, %s37_s16, [#allocation6], %s675_s11, %s675_s11, %s676_s12  }
  0x24   :  { %666 = dma.done.wait [#allocation3], 256  }
  0x25   :  { %667 = vsyncadd [#allocation3], 4294967040 }
  0x26   :  { %668 = dma.done.wait [#allocation6], 2048  }
  0x27   :  { %669 = vsyncadd [#allocation6], 4294965248  ;;  %v678_v0 = vmov 0.0|0.0   ;;  %vm679_vm0 = vmmov 0   ;;  %v680_v1 = vmov 0.0   ;;  %v56_v2 = vld [vmem:[#allocation2] sm:$0xff] }
  0x28   :  { %520 = vmatprep.subr.bf16.mxu0 %v678_v0  ;;  %532 = vmatprep.subr.bf16.mxu1 %v678_v0  ;;  %v63_v3 = vld [vmem:[#allocation5] sm:$0xff]  ;;  %v64_v4 = vld [vmem:[#allocation5 + $0x8] sm:$0xff]  ;;  %s681_s26 = smov 32   ;;  %v65_v6 = vld [vmem:[#allocation5 + $0x10] sm:$0xff]  ;;  %vm61_vm1 = vcmask 261120   ;;  %vm78_vm2 = vcmask 523264  }
  0x29   :  { %487 = vmatprep.mubr.msk.f32.mxu0 %vm679_vm0, %v680_v1  ;;  %506 = vmatprep.mubr.msk.f32.mxu1 %vm679_vm0, %v680_v1  ;;  %v521_v5 = vpack.c.bf16 %v64_v4, %v63_v3  ;;  %v66_v7 = vld [vmem:[#allocation5 + $0x18] sm:$0xff]  ;;  %v67_v9 = vld [vmem:[#allocation5 + $0x20] sm:$0xff]  ;;  %v68_v10 = vld [vmem:[#allocation5 + $0x28] sm:$0xff]  ;;  %s683_s30 = smov 96   ;;  %vm393_vm3 = vcmask 130048   ;;  %s684_s20 = smov [#allocation8]  }
  0x2a   :  { %58 = vrot.lane.b32.xlu0 %v56_v2, %s681_s26  ;;  %v524_v8 = vpack.c.bf16 %v66_v7, %v65_v6  ;;  %v527_v11 = vpack.c.bf16 %v68_v10, %v67_v9  ;;  %v69_v12 = vld [vmem:[#allocation5 + $0x30] sm:$0xff]  ;;  %v70_v13 = vld [vmem:[#allocation5 + $0x38] sm:$0xff]  ;;  %v190_v30 = vld [vmem:[#allocation5 + $0x40] sm:$0xff]  ;;  %s422_s21 = sshll.u32 %s684_s20, 4  ;;  %s423_s21 = int_to_ptr.vmem [resolvable:$true] %s422_s21 }
  0x2b   :  { %522 = vmatpush3.bf16.msra.mxu0 %v521_v5  ;;  %v530_v14 = vpack.c.bf16 %v70_v13, %v69_v12  ;;  %v55_v15 = vld [vmem:[%s840_s0] sm:$0xff]  ;;  %s682_s0 = smov 64   ;;  %v191_v31 = vld [vmem:[#allocation5 + $0x48] sm:$0xff]  ;;  %v192_v32 = vld [vmem:[#allocation5 + $0x50] sm:$0xff]  ;;  %s622_s22 = scalar_lea.vmem %s423_s21, 256 }
  0x2c   :  { %523 = vmatprep.subr.bf16.mxu0 %v678_v0  ;;  %v439_v18 = vld [vmem:[%s843_s3] ss:$0 sm:$0xff]  ;;  %v533_v33 = vpack.c.bf16 %v191_v31, %v190_v30  ;;  %v194_v36 = vld [vmem:[#allocation5 + $0x60] sm:$0xff]  ;;  %v195_v37 = vld [vmem:[#allocation5 + $0x68] sm:$0xff]  ;;  %p623_p2 = scmp.ne.s32.totalorder %s423_s21, %s622_s22  ;;  %p627_p3 = scmp.lt.s32.totalorder %s423_s21, %s423_s21 }
  0x2d   :  { %v193_v34 = vld [vmem:[#allocation5 + $0x58] sm:$0xff]  ;;  %v539_v38 = vpack.c.bf16 %v195_v37, %v194_v36  ;;  %v196_v40 = vld [vmem:[#allocation5 + $0x70] sm:$0xff]  ;;  %v311_v2 = vld [vmem:[%s844_s4 + $0x8] sm:$0xff]  ;;  %p628_p4 = scmp.lt.s32.totalorder %s622_s22, %s622_s22 }
  0x2e   :  { %534 = vmatpush3.bf16.msra.mxu1 %v533_v33  ;;  %v536_v35 = vpack.c.bf16 %v193_v34, %v192_v32  ;;  %v197_v41 = vld [vmem:[#allocation5 + $0x78] sm:$0xff]  ;;  %v312_v3 = vld [vmem:[%s844_s4 + $0x10] sm:$0xff]  ;;  %v313_v5 = vld [vmem:[%s844_s4 + $0x18] sm:$0xff] }
  0x2f   :  { %525 = vmatpush3.bf16.msra.mxu0 %v524_v8  ;;  %535 = vmatprep.subr.bf16.mxu1 %v678_v0  ;;  %v183_v42 = vld [vmem:[#allocation2 + $0x8] sm:$0xff]  ;;  %v542_v43 = vpack.c.bf16 %v197_v41, %v196_v40  ;;  %v548_v6 = vpack.c.bf16 %v313_v5, %v312_v3  ;;  %p629_p5 = por %p628_p4, %p627_p3 }
  0x30   :  { %526 = vmatprep.subr.bf16.mxu0 %v678_v0  ;;  %v443_v52 = vld [vmem:[%s843_s3 + $0x1] ss:$0 sm:$0xff] }
  0x31   :  { %p630_p6 = pnand %p629_p5, %p623_p2 }
  0x32   :  { %537 = vmatpush3.bf16.msra.mxu1 %v536_v35 }
  0x33   :  { %528 = vmatpush3.bf16.msra.mxu0 %v527_v11  ;;  %538 = vmatprep.subr.bf16.mxu1 %v678_v0 }
  0x34   :  { %529 = vmatprep.subr.bf16.mxu0 %v678_v0 }
  0x36   :  { %540 = vmatpush3.bf16.msra.mxu1 %v539_v38 }
  0x37   :  { %531 = vmatpush3.bf16.msra.mxu0 %v530_v14  ;;  %541 = vmatprep.subr.bf16.mxu1 %v678_v0 }
  0x38   :  { %544 = vmatprep.subr.bf16.mxu0 %v678_v0 }
  0x3a   :  { %543 = vmatpush3.bf16.msra.mxu1 %v542_v43 }
  0x9c   :  { %v59_v16 = vpop.permute.xlu0 %58 }
  0x9d   :  { %v62_v17 = vsel %vm61_vm1, %v55_v15, %v59_v16 }
  0x9e   :  { %488 = vmatmul.mubr.msk.f32.vlgmr.msra.gmra.mrb[0].mxu0 %vm78_vm2, %v62_v17 }
  0x9f   :  { %517 = vmatprep.mubr.msk.f32.mxu0 %vm679_vm0, %v680_v1  ;;  %v310_v1 = vld [vmem:[%s844_s4] sm:$0xff] }
  0xa0   :  { %v545_v4 = vpack.c.bf16 %v311_v2, %v310_v1 }
  0xa2   :  { %546 = vmatpush3.bf16.msra.mxu0 %v545_v4 }
  0xa3   :  { %547 = vmatprep.subr.bf16.mxu0 %v678_v0  ;;  %v446_v0 = vld [vmem:[%s845_s5] ss:$0 sm:$0xff] }
  0xa6   :  { %549 = vmatpush3.bf16.msra.mxu0 %v548_v6 }
 0x171   :  { %v148_v19 = vpop.f32.mrb[0].mxu0 }
 0x172   :  { %v149_v20 = vadd.f32 %v439_v18, %v148_v19  ;;  %v489_v21 = vpop.f32.mrb[1].mxu0 }
 0x174   :  { %159 = vrot.lane.b32.xlu0 %v149_v20, %s681_s26  ;;  %v441_v22 = vmul.f32 -1.442695, %v149_v20 }
 0x176   :  { %562 = vpow2.f32 %v441_v22 }
 0x180   :  { %v563_v23 = vpop.eup %562 }
 0x181   :  { %v155_v24 = vadd.f32 1.0, %v563_v23 }
 0x183   :  { %564 = vrcp.f32 %v155_v24 }
 0x18d   :  { %v565_v25 = vpop.eup %564 }
 0x18e   :  { %v169_v44 = vsub.f32 1.0, %v565_v25  ;;  %v175_v46 = vmul.f32 %v565_v25, %v59_v16 }
 0x1e6   :  { %v160_v26 = vpop.permute.xlu0 %159 }
 0x1e7   :  { %v162_v27 = vmul.f32 %v565_v25, %v160_v26 }
 0x1e9   :  { %164 = vrot.lane.b32.xlu1 %v162_v27, %s682_s0 }
 0x25b   :  { %v165_v28 = vpop.permute.xlu1 %164 }
 0x25c   :  { %v167_v29 = vadd.f32 %v165_v28, %v149_v20 }
 0x25e   :  { %566 = vtanh.f32 %v167_v29 }
 0x268   :  { %v567_v39 = vpop.eup %566 }
 0x269   :  { %171 = vrot.lane.b32.xlu1 %v567_v39, %s683_s30 }
 0x26d   :  { %185 = vrot.lane.b32.xlu1 %v183_v42, %s681_s26 }
 0x2db   :  { %v172_v45 = vpop.permute.xlu1 %171 }
 0x2dc   :  { %v174_v47 = vmul.f32 %v172_v45, %v169_v44 }
 0x2de   :  { %v176_v48 = vadd.f32 %v175_v46, %v174_v47 }
 0x2df   :  { %v186_v49 = vpop.permute.xlu1 %185 }
 0x2e0   :  { %178 = vrot.lane.b32.xlu0 %v176_v48, %s683_s30 }
 0x352   :  { %v179_v50 = vpop.permute.xlu0 %178 }
 0x353   :  { %181 = vst.msk [vmem:[#allocation8] sm:$0xff] %vm61_vm1, %v179_v50  ;;  %v188_v51 = vsel %vm61_vm1, %v179_v50, %v186_v49 }
 0x354   :  { %507 = vmatmul.mubr.msk.f32.vlgmr.msra.gmra.mrb[0].mxu1 %vm78_vm2, %v188_v51 }
 0x427   :  { %v275_v53 = vpop.f32.mrb[0].mxu1 }
 0x428   :  { %v276_v54 = vadd.f32 %v443_v52, %v275_v53  ;;  %v508_v55 = vpop.f32.mrb[1].mxu1 }
 0x42a   :  { %286 = vrot.lane.b32.xlu0 %v276_v54, %s681_s26  ;;  %v445_v56 = vmul.f32 -1.442695, %v276_v54 }
 0x42c   :  { %568 = vpow2.f32 %v445_v56 }
 0x436   :  { %v569_v57 = vpop.eup %568 }
 0x437   :  { %v282_v58 = vadd.f32 1.0, %v569_v57 }
 0x439   :  { %570 = vrcp.f32 %v282_v58 }
 0x443   :  { %v571_v59 = vpop.eup %570 }
 0x444   :  { %v296_v8 = vsub.f32 1.0, %v571_v59  ;;  %v302_v10 = vmul.f32 %v571_v59, %v186_v49 }
 0x49c   :  { %v287_v60 = vpop.permute.xlu0 %286 }
 0x49d   :  { %v289_v61 = vmul.f32 %v571_v59, %v287_v60 }
 0x49f   :  { %291 = vrot.lane.b32.xlu1 %v289_v61, %s682_s0 }
 0x511   :  { %v292_v62 = vpop.permute.xlu1 %291 }
 0x512   :  { %v294_v63 = vadd.f32 %v292_v62, %v276_v54 }
 0x514   :  { %572 = vtanh.f32 %v294_v63 }
 0x51e   :  { %v573_v7 = vpop.eup %572 }
 0x51f   :  { %298 = vrot.lane.b32.xlu0 %v573_v7, %s683_s30 }
 0x591   :  { %v299_v9 = vpop.permute.xlu0 %298 }
 0x592   :  { %v301_v11 = vmul.f32 %v299_v9, %v296_v8 }
 0x594   :  { %v303_v12 = vadd.f32 %v302_v10, %v301_v11 }
 0x596   :  { %305 = vrot.lane.b32.xlu1 %v303_v12, %s683_s30 }
 0x608   :  { %v306_v13 = vpop.permute.xlu1 %305 }
 0x609   :  { %309 = vst.msk [vmem:[#allocation8 + $0x8] sm:$0xff] %vm61_vm1, %v306_v13  ;;  %518 = vmatmul.mubr.msk.f32.vlgmr.msra.gmra.mrb[2].mxu0 %vm61_vm1, %v306_v13 }
 0x6dc   :  { %v389_v14 = vpop.f32.mrb[2].mxu0 }
 0x6dd   :  { %v390_v15 = vadd.f32 %v446_v0, %v389_v14  ;;  %v519_v16 = vpop.f32.mrb[3].mxu0 }
 0x6df   :  { %v394_v17 = vsel %vm393_vm3, %v390_v15, -inf }
 0x6e0   :  { %395 = vmax.xlane.f32.xlu0 %v394_v17 }
 0x76d   :  { %v396_v18 = vpop.xlane.xlu0 %395 }
 0x76e   :  { %v397_v19 = vsub.f32 %v390_v15, %v396_v18 }
 0x770   :  { %v398_v20 = vmul.f32 1.442695, %v397_v19 }
 0x772   :  { %574 = vpow2.f32 %v398_v20 }
 0x77c   :  { %v575_v21 = vpop.eup %574 }
 0x77d   :  { %v400_v22 = vsel %vm393_vm3, %v575_v21, 0.0 }
 0x77e   :  { %401 = vadd.xlane.f32.xlu1 %v400_v22 }
 0x77f   :  { %633 = shalt.err (!%p630_p6)
}
 0x780   :  { %s634_s24 = scalar_lea.hbm %s847_s7, 256 }
 0x781   :  { %p635_p7 = scmp.ne.s32.totalorder %s847_s7, %s634_s24  ;;  %p638_p8 = scmp.lt.u32.totalorder %s634_s24, %s847_s7 }
 0x783   :  { %p640_p9 = pnand %p638_p8, %p635_p7 }
 0x785   :  { %643 = shalt.err (!%p640_p9)
}
 0x786   :  { %428 = dma.vmem_to_hbm [thread:$0]  %s423_s21, 256, %s847_s7, [#allocation9], %s675_s11, %s675_s11, %s676_s12  }
 0x787   :  { %s685_s29 = smov [#allocation7]  }
 0x788   :  { %s413_s0 = sshll.u32 %s685_s29, 4  ;;  %s414_s0 = int_to_ptr.vmem [resolvable:$true] %s413_s0 }
 0x789   :  { %s644_s30 = scalar_lea.vmem %s414_s0, 128  ;;  %p649_p11 = scmp.lt.s32.totalorder %s414_s0, %s414_s0 }
 0x78a   :  { %p645_p10 = scmp.ne.s32.totalorder %s414_s0, %s644_s30  ;;  %p650_p12 = scmp.lt.s32.totalorder %s644_s30, %s644_s30 }
 0x78c   :  { %p651_p13 = por %p650_p12, %p649_p11 }
 0x78e   :  { %p652_p0 = pnand %p651_p13, %p645_p10 }
 0x80b   :  { %v402_v23 = vpop.xlane.xlu1 %401 }
 0x80c   :  { %576 = vlog2.f32 %v402_v23 }
 0x816   :  { %v577_v24 = vpop.eup %576 }
 0x817   :  { %v404_v25 = vmul.f32 0.6931472, %v577_v24 }
 0x819   :  { %v405_v26 = vsub.f32 %v397_v19, %v404_v25 }
 0x81b   :  { %406 = vst.msk [vmem:[#allocation7] sm:$0xff] %vm393_vm3, %v405_v26 }
 0x81c   :  { %655 = shalt.err (!%p652_p0)
}
 0x81d   :  { %s656_s7 = scalar_lea.hbm %s846_s6, 128 }
 0x81e   :  { %p657_p1 = scmp.ne.s32.totalorder %s846_s6, %s656_s7  ;;  %p660_p2 = scmp.lt.u32.totalorder %s656_s7, %s846_s6 }
 0x820   :  { %p662_p3 = pnand %p660_p2, %p657_p1 }
 0x822   :  { %665 = shalt.err (!%p662_p3)
}
 0x823   :  { %416 = dma.vmem_to_hbm [thread:$0]  %s414_s0, 128, %s846_s6, [#allocation4]  }
 0x824   :  { %670 = dma.done.wait [#allocation4], 128  }
 0x825   :  { %671 = vsyncadd [#allocation4], 4294967168 }
 0x826   :  { %672 = dma.done.wait [#allocation9], 256  }
 0x827   :  { %673 = vsyncadd [#allocation9], 4294967040 }
 0x828   :  { %435 = vsyncpa [#allocation3], 1 }
 0x829   :  { %436 = vsyncpa [#allocation6], 1 }
 0x82a   :  { %437 = vsyncpa [#allocation4], 1 }
 0x82b   :  { %438 = vsyncpa [#allocation9], 1 }

</bundles_post_ra>
